<compile_context>
chip_gen: v5e
topology: v5e:2x2
jax: 0.10.0
libtpu: 0.0.40
codegen_flags: <defaults>
</compile_context>

<pallas_src>
import functools

import jax
import jax.numpy as jnp
from jax import lax
from jax.experimental import pallas as pl
from jax.experimental.pallas import tpu as pltpu

LANES = 128
TILE_R = 1024      # rows per grid step -> 512 KiB f32 per input tile
NCORES = 2         # leading "parallel" axis (sharded across TCs on v7x)


def _round_up(x, m):
    return ((x + m - 1) // m) * m


def _l2_loss_kernel(s_ref, t_ref, o_ref, acc_ref, *,
                    rows, tile_r, bpc, need_mask):
    c = pl.program_id(0)   # core-parallel axis
    j = pl.program_id(1)   # row-block (reduction) axis

    @pl.when(j == 0)
    def _():
        acc_ref[...] = jnp.zeros_like(acc_ref)

    d = s_ref[...].astype(jnp.float32) - t_ref[...].astype(jnp.float32)
    sq = d * d

    if need_mask:
        # Zero contributions from (a) rows past the end of the array in the
        # trailing partial block and (b) duplicated blocks produced by the
        # clamped index_map when nblocks does not divide evenly by NCORES.
        base_row = (c * bpc + j) * tile_r
        row_ids = lax.broadcasted_iota(jnp.int32, (tile_r, LANES), 0) + base_row
        sq = jnp.where(row_ids < rows, sq, 0.0)

    # Lane-parallel partial sums (mostly VPU adds); the expensive cross-lane
    # reduction happens exactly once, in the epilogue below.
    acc_ref[...] += jnp.sum(sq, axis=0, keepdims=True)

    @pl.when(j == pl.num_programs(1) - 1)
    def _():
        o_ref[...] = jnp.sum(acc_ref[...]).reshape(1, 1, 1)


@jax.jit
def l2_loss(student_output, teacher_output):
    assert student_output.shape == teacher_output.shape
    n = student_output.size

    s = student_output.reshape(-1)
    t = teacher_output.reshape(-1)

    rows = pl.cdiv(n, LANES)
    if rows >= TILE_R:
        tile_r = TILE_R
    else:
        # Tiny input: round rows up to a packing-friendly multiple so one full
        # block covers everything (works for f32/bf16/int8 sublane packing).
        tile_r = _round_up(rows, 32)
        rows = tile_r

    lane_pad = rows * LANES - n
    if lane_pad:
        # Only hit when n is not a multiple of 128 (or for tiny inputs).  For
        # lane-aligned inputs (the common case) this branch is skipped and the
        # kernel reads the original buffers with zero extra HBM traffic.
        # TODO(synk): a fully copy-free ragged tail would need manual DMA.
        s = jnp.pad(s, (0, lane_pad))
        t = jnp.pad(t, (0, lane_pad))

    s2 = s.reshape(rows, LANES)
    t2 = t.reshape(rows, LANES)

    nblocks = pl.cdiv(rows, tile_r)
    bpc = pl.cdiv(nblocks, NCORES)                      # row-blocks per core
    need_mask = (rows % tile_r != 0) or (nblocks % NCORES != 0)

    def in_index_map(c, j):
        # Clamp so the pipeline DMA never walks past the array; any duplicated
        # block is fully masked to zero inside the kernel.
        return (jnp.minimum(c * bpc + j, nblocks - 1), 0)

    kernel = functools.partial(
        _l2_loss_kernel, rows=rows, tile_r=tile_r, bpc=bpc, need_mask=need_mask)

    partials = pl.pallas_call(
        kernel,
        out_shape=jax.ShapeDtypeStruct((NCORES, 1, 1), jnp.float32),
        grid_spec=pltpu.PrefetchScalarGridSpec(
            num_scalar_prefetch=0,
            grid=(NCORES, bpc),
            in_specs=[
                pl.BlockSpec((tile_r, LANES), in_index_map),
                pl.BlockSpec((tile_r, LANES), in_index_map),
            ],
            out_specs=pl.BlockSpec((1, 1, 1), lambda c, j: (c, 0, 0)),
            scratch_shapes=[pltpu.VMEM((1, LANES), jnp.float32)],
        ),
        compiler_params=pltpu.CompilerParams(
            dimension_semantics=("parallel", "arbitrary"),
        ),
    )(s2, t2)

    # Mean over the *original* element count.
    return (jnp.sum(partials) / jnp.float32(n)).astype(jnp.float32)


if __name__ == "__main__":
    key = jax.random.PRNGKey(0)

    # Primary small test, NCHW-like distillation outputs.
    k1, k2 = jax.random.split(key)
    student = jax.random.normal(k1, (2, 4, 16, 16), dtype=jnp.float32)
    teacher = jax.random.normal(k2, (2, 4, 16, 16), dtype=jnp.float32)
    loss = l2_loss(student, teacher)
    jax.block_until_ready(loss)
    ref = jnp.mean((student - teacher) ** 2)
    assert jnp.allclose(loss, ref, rtol=1e-5, atol=1e-6), (loss, ref)

    # Ragged size (not a multiple of 128) exercises the lane-pad + mask path.
    k3, k4 = jax.random.split(k1)
    a = jax.random.normal(k3, (3, 5, 7, 11), dtype=jnp.float32)
    b = jax.random.normal(k4, (3, 5, 7, 11), dtype=jnp.float32)
    loss2 = l2_loss(a, b)
    jax.block_until_ready(loss2)
    ref2 = jnp.mean((a - b) ** 2)
    assert jnp.allclose(loss2, ref2, rtol=1e-5, atol=1e-6), (loss2, ref2)

    # Larger lane-aligned size: copy-free path, multiple blocks, odd block
    # count (exercises the clamped/duplicated-block masking on the 2nd core).
    k5, k6 = jax.random.split(k2)
    c = jax.random.normal(k5, (4, 1024, 160), dtype=jnp.float32)
    d = jax.random.normal(k6, (4, 1024, 160), dtype=jnp.float32)
    loss3 = l2_loss(c, d)
    jax.block_until_ready(loss3)
    ref3 = jnp.mean((c - d) ** 2)
    assert jnp.allclose(loss3, ref3, rtol=1e-4, atol=1e-6), (loss3, ref3)

    print("KERNEL_OK")
</pallas_src>

<mosaic_0001>
module attributes {stable_mosaic.version = 11 : i64} {
  func.func @_l2_loss_kernel(%arg0: i32, %arg1: i32, %arg2: memref<32x128xf32, #tpu.memory_space<vmem>>, %arg3: memref<32x128xf32, #tpu.memory_space<vmem>>, %arg4: memref<1x1x1xf32, #tpu.memory_space<vmem>>, %arg5: memref<1x128xf32, #tpu.memory_space<vmem>>) attributes {dimension_semantics = [#tpu.dimension_semantics<parallel>, #tpu.dimension_semantics<arbitrary>], iteration_bounds = array<i64: 2, 1>, scalar_prefetch = 0 : i64, scratch_operands = 1 : i64, tpu.core_type = #tpu.core_type<tc>, window_params = [{transform_indices = @transform_0, window_bounds = array<i64: 32, 128>}, {transform_indices = @transform_1, window_bounds = array<i64: 32, 128>}, {transform_indices = @transform_2, window_bounds = array<i64: 1, 1, 1>}]} {
    %c0_i32 = arith.constant 0 : i32
    %0 = arith.cmpi eq, %arg1, %c0_i32 : i32
    %1 = arith.extui %0 : i1 to i32
    %c0_i32_0 = arith.constant 0 : i32
    %2 = arith.cmpi ne, %1, %c0_i32_0 : i32
    scf.if %2 {
      %cst_12 = arith.constant 0.000000e+00 : f32
      %25 = vector.broadcast %cst_12 : f32 to vector<1x128xf32>
      %c0_13 = arith.constant 0 : index
      %c0_14 = arith.constant 0 : index
      %26 = vector.load %arg5[%c0_13, %c0_14] : memref<1x128xf32, #tpu.memory_space<vmem>>, vector<1x128xf32>
      tpu.vector_store %arg5[%c0_13, %c0_14], %25 {strides = array<i32>} : memref<1x128xf32, #tpu.memory_space<vmem>>, vector<1x128xf32>,
    } else {
    }
    %c0 = arith.constant 0 : index
    %c0_1 = arith.constant 0 : index
    %3 = vector.load %arg2[%c0, %c0_1] : memref<32x128xf32, #tpu.memory_space<vmem>>, vector<32x128xf32>
    %c0_2 = arith.constant 0 : index
    %c0_3 = arith.constant 0 : index
    %4 = vector.load %arg3[%c0_2, %c0_3] : memref<32x128xf32, #tpu.memory_space<vmem>>, vector<32x128xf32>
    %5 = arith.subf %3, %4 : vector<32x128xf32>
    %6 = arith.mulf %5, %5 : vector<32x128xf32>
    %c1_i32 = arith.constant 1 : i32
    %7 = arith.muli %arg0, %c1_i32 : i32
    %8 = arith.addi %7, %arg1 : i32
    %c32_i32 = arith.constant 32 : i32
    %9 = arith.muli %8, %c32_i32 : i32
    %10 = tpu.iota {dimensions = array<i32: 0>} : vector<32x128xi32>
    %11 = vector.broadcast %9 : i32 to vector<32x128xi32>
    %12 = arith.addi %10, %11 : vector<32x128xi32>
    %c32_i32_4 = arith.constant 32 : i32
    %13 = vector.broadcast %c32_i32_4 : i32 to vector<32x128xi32>
    %14 = arith.cmpi slt, %12, %13 : vector<32x128xi32>
    %cst = arith.constant 0.000000e+00 : f32
    %15 = vector.broadcast %cst : f32 to vector<32x128xf32>
    %16 = arith.select %14, %6, %15 : vector<32x128xi1>, vector<32x128xf32>
    %c0_5 = arith.constant 0 : index
    %c0_6 = arith.constant 0 : index
    %17 = vector.load %arg5[%c0_5, %c0_6] : memref<1x128xf32, #tpu.memory_space<vmem>>, vector<1x128xf32>
    %cst_7 = arith.constant dense<0.000000e+00> : vector<128xf32>
    %18 = vector.multi_reduction <add>, %16, %cst_7 [0] : vector<32x128xf32> to vector<128xf32>
    %19 = vector.shape_cast %18 : vector<128xf32> to vector<1x128xf32>
    %20 = arith.addf %17, %19 : vector<1x128xf32>
    %c0_8 = arith.constant 0 : index
    %c0_9 = arith.constant 0 : index
    %21 = vector.load %arg5[%c0_8, %c0_9] : memref<1x128xf32, #tpu.memory_space<vmem>>, vector<1x128xf32>
    tpu.vector_store %arg5[%c0_8, %c0_9], %20 {strides = array<i32>} : memref<1x128xf32, #tpu.memory_space<vmem>>, vector<1x128xf32>,
    %c0_i32_10 = arith.constant 0 : i32
    %22 = arith.cmpi eq, %arg1, %c0_i32_10 : i32
    %23 = arith.extui %22 : i1 to i32
    %c0_i32_11 = arith.constant 0 : i32
    %24 = arith.cmpi ne, %23, %c0_i32_11 : i32
    scf.if %24 {
      %c0_12 = arith.constant 0 : index
      %c0_13 = arith.constant 0 : index
      %25 = vector.load %arg5[%c0_12, %c0_13] : memref<1x128xf32, #tpu.memory_space<vmem>>, vector<1x128xf32>
      %26 = vector.shape_cast %25 : vector<1x128xf32> to vector<1x1x128xf32>
      %cst_14 = arith.constant dense<0.000000e+00> : vector<1xf32>
      %27 = vector.multi_reduction <add>, %26, %cst_14 [1, 2] : vector<1x1x128xf32> to vector<1xf32>
      %28 = vector.shape_cast %27 : vector<1xf32> to vector<1x1x1xf32>
      %29 = vector.extract %28[0, 0, 0] : f32 from vector<1x1x1xf32>
      %30 = vector.broadcast %29 : f32 to vector<1x1x1xf32>
      %c0_15 = arith.constant 0 : index
      %c0_16 = arith.constant 0 : index
      %c0_17 = arith.constant 0 : index
      %31 = vector.load %arg4[%c0_15, %c0_16, %c0_17] : memref<1x1x1xf32, #tpu.memory_space<vmem>>, vector<1x1x1xf32>
      tpu.vector_store %arg4[%c0_15, %c0_16, %c0_17], %30 {strides = array<i32>} : memref<1x1x1xf32, #tpu.memory_space<vmem>>, vector<1x1x1xf32>,
    } else {
    }
    return
  }
  func.func @transform_0(%arg0: i32, %arg1: i32) -> (i32, i32) {
    %c1_i32 = arith.constant 1 : i32
    %0 = arith.muli %arg0, %c1_i32 : i32
    %1 = arith.addi %0, %arg1 : i32
    %c0_i32 = arith.constant 0 : i32
    %2 = arith.minsi %1, %c0_i32 : i32
    %c0_i32_0 = arith.constant 0 : i32
    %c0_i32_1 = arith.constant 0 : i32
    return %2, %c0_i32_0 : i32, i32
  }
  func.func @transform_1(%arg0: i32, %arg1: i32) -> (i32, i32) {
    %c1_i32 = arith.constant 1 : i32
    %0 = arith.muli %arg0, %c1_i32 : i32
    %1 = arith.addi %0, %arg1 : i32
    %c0_i32 = arith.constant 0 : i32
    %2 = arith.minsi %1, %c0_i32 : i32
    %c0_i32_0 = arith.constant 0 : i32
    %c0_i32_1 = arith.constant 0 : i32
    return %2, %c0_i32_0 : i32, i32
  }
  func.func @transform_2(%arg0: i32, %arg1: i32) -> (i32, i32, i32) {
    %c0_i32 = arith.constant 0 : i32
    %c0_i32_0 = arith.constant 0 : i32
    %c0_i32_1 = arith.constant 0 : i32
    return %arg0, %c0_i32, %c0_i32_0 : i32, i32, i32
  }
}

</mosaic_0001>

<bundles_post_ra>
// kernel: l2_loss.1
= control target key start
LH: loop header
LB: loop body
LE: loop exit
PB: predicated region body
PF: predicated region fallthrough
CT: control target
= control target key end

     0   :  { %s435_s9 = smov 0   ;;  %s437_s10 = smov 0   ;;  %s478_s0 = inlined_call_operand.vmem [shape: f32[32,128], index: 0, kind: input, shape index: {}]   ;;  %s479_s1 = inlined_call_operand.vmem [shape: f32[32,128], index: 1, kind: input, shape index: {}]   ;;  %s480_s2 = inlined_call_operand.vmem [shape: f32[2,1,1], index: 2, kind: output, shape index: {}]  }
   0x1   :  { %s439_s11 = smov 0  }
   0x2 LB: > { %s24_s12 = sadd.s32 1, %s413_s10  ;;  %p360_p0 = scmp.ge.s32.totalorder %s417_s11, 1  ;;  %s417_s11 = sphi %s439_s11, %s12_s11   ;;  %s413_s10 = sphi %s437_s10, %s482_s10   ;;  %s409_s9 = sphi %s435_s9, %s481_s9  }
   0x3   : > { %p26_p1 = scmp.ge.s32.totalorder %s24_s12, 2  ;;  %p160_p2 = scmp.lt.s32.totalorder %s417_s11, 3 }
   0x5   : > { %s484_s12 = smov (%p26_p1, %s24_s12), 0  ;;  %p161_p3 = pnand %p360_p0, %p160_p2 }
   0x6   : > { %p192_p4 = scmp.lt.s32.totalorder (!%p161_p3), %s409_s9, 0  ;;  %s365_s15 = sshll.u32 (!%p161_p3), %s409_s9, 5 }
   0x7   : > { %164 = sbr.rel (%p161_p3) target bundleno = 236 (0xec), region = 28  ;;  %p215_p6 = scmp.lt.s32.totalorder (!%p161_p3), %s409_s9, 1 }
   0xc   : > { %v241_v0 = vlaneseq  ;;  %v419_v1 = vmov 0.0   ;;  %s193_s13 = scalar_select %p192_p4, %s409_s9, 0  ;;  %v246_v5 = vstv %s365_s15  ;;  %vm275_vm4 = vcmask 1040384  }
   0xd   : > { %222 = vst [vmem:[#allocation2] sm:$0x1] %v419_v1  ;;  %s488_s9 = smov (!%p215_p6, %s409_s9), 1  ;;  %vm287_vm5 = vcmask 0  }
   0xe   : > { %v242_v2 = vshrl.u32 %v241_v0, 7  ;;  %s361_s14 = sshll.u32 %s193_s13, 2  ;;  %s217_s25 = scalar_lea.vmem %s480_s2, %s488_s9 }
   0xf   : > { %p195_p5 = scmp.lt.s32.totalorder %s361_s14, 3 }
  0x10   : > { %v243_v3 = vadd.s32 8, %v242_v2  ;;  %v244_v4 = vadd.s32 16, %v242_v2  ;;  %v245_v6 = vadd.s32 24, %v242_v2  ;;  %v247_v7 = vadd.s32 %v246_v5, %v242_v2 }
  0x11   : > { %s486_s14 = smov (!%p195_p5, %s361_s14), 3 }
  0x12   : > { %s362_s16 = sshll.u32 %s486_s14, 3  ;;  %v248_v8 = vadd.s32 %v246_v5, %v243_v3  ;;  %v249_v12 = vadd.s32 %v246_v5, %v244_v4  ;;  %v250_v16 = vadd.s32 %v246_v5, %v245_v6  ;;  %vm251_vm0 = vcmp.lt.s32.totalorder %v247_v7, 32 }
  0x13   : > { %s198_s19 = scalar_lea.vmem %s478_s0, %s362_s16  ;;  %s210_s22 = scalar_lea.vmem %s479_s1, %s362_s16 }
  0x14   : > { %v223_v9 = vld [vmem:[%s198_s19] sm:$0xff]  ;;  %v224_v10 = vld [vmem:[%s198_s19 + $0x8] sm:$0xff]  ;;  %v225_v11 = vld [vmem:[%s198_s19 + $0x10] sm:$0xff]  ;;  %vm252_vm1 = vcmp.lt.s32.totalorder %v248_v8, 32  ;;  %vm253_vm2 = vcmp.lt.s32.totalorder %v249_v12, 32  ;;  %vm254_vm3 = vcmp.lt.s32.totalorder %v250_v16, 32 }
  0x15   : > { %v226_v13 = vld [vmem:[%s198_s19 + $0x18] sm:$0xff]  ;;  %v227_v14 = vld [vmem:[%s210_s22] sm:$0xff]  ;;  %v228_v15 = vld [vmem:[%s210_s22 + $0x8] sm:$0xff] }
  0x16   : > { %v229_v17 = vld [vmem:[%s210_s22 + $0x10] sm:$0xff]  ;;  %v230_v18 = vld [vmem:[%s210_s22 + $0x18] sm:$0xff]  ;;  %v231_v19 = vsub.f32 %v223_v9, %v227_v14  ;;  %v232_v20 = vsub.f32 %v224_v10, %v228_v15  ;;  %v259_v39 = vld [vmem:[#allocation2] sm:$0x1] }
  0x17   : > { %v233_v21 = vsub.f32 %v225_v11, %v229_v17  ;;  %v234_v22 = vsub.f32 %v226_v13, %v230_v18 }
  0x18   : > { %v235_v23 = vmul.f32 %v231_v19, %v231_v19  ;;  %v236_v24 = vmul.f32 %v232_v20, %v232_v20 }
  0x19   : > { %v237_v25 = vmul.f32 %v233_v21, %v233_v21  ;;  %v238_v26 = vmul.f32 %v234_v22, %v234_v22 }
  0x1a   : > { %v255_v27 = vsel %vm251_vm0, %v235_v23, 0.0  ;;  %v256_v28 = vsel %vm252_vm1, %v236_v24, 0.0 }
  0x1b   : > { %v257_v29 = vsel %vm253_vm2, %v237_v25, 0.0  ;;  %v260_v30 = vadd.f32 %v256_v28, %v255_v27  ;;  %v258_v31 = vsel %vm254_vm3, %v238_v26, 0.0 }
  0x1d   : > { %v261_v32 = vadd.f32 %v260_v30, %v257_v29 }
  0x1f   : > { %v262_v33 = vadd.f32 %v261_v32, %v258_v31 }
  0x21   : > { %v263_v34 = vrot.slane %v262_v33, 4 }
  0x23   : > { %v264_v35 = vadd.f32 %v263_v34, %v262_v33 }
  0x25   : > { %v265_v36 = vrot.slane %v264_v35, 2 }
  0x27   : > { %v266_v37 = vadd.f32 %v265_v36, %v264_v35 }
  0x29   : > { %v267_v38 = vrot.slane %v266_v37, 1 }
  0x2b   : > { %v268_v40 = vadd.f32 %v267_v38, %v266_v37 }
  0x2d   : > { %v269_v41 = vadd.f32 %v268_v40, %v259_v39 }
  0x2f   : > { %270 = vst [vmem:[#allocation2] sm:$0x1] %v269_v41 }
  0x36   : > { %v274_v42 = vld [vmem:[#allocation2] sm:$0x1] }
  0x37   : > { %v276_v43 = vsel %vm275_vm4, %v274_v42, 0.0 }
  0x38   : > { %277 = vadd.xlane.f32.xlu0 %v276_v43 }
  0xab   : > { %v278_v44 = vpop.xlane.xlu0 %277 }
  0xac   : > { %v279_v45 = vrot.slane %v278_v44, 4 }
  0xae   : > { %v280_v46 = vadd.f32 %v279_v45, %v278_v44 }
  0xb0   : > { %v281_v47 = vrot.slane %v280_v46, 2 }
  0xb2   : > { %v282_v48 = vadd.f32 %v281_v47, %v280_v46 }
  0xb4   : > { %v283_v49 = vrot.slane %v282_v48, 1 }
  0xb6   : > { %v284_v50 = vadd.f32 %v283_v49, %v282_v48 }
  0xb8   : > { %368 = vpush %v284_v50 }
  0xe9   : > { %s369_s26 = spop %368 }
  0xea   : > { %v286_v51 = vstv %s369_s26 }
  0xeb   : > { %288 = vst.msk [vmem:[%s217_s25] sm:$0x1] %vm287_vm5, %v286_v51 }
  0xec PF: > { %s12_s11 = sadd.s32 1, %s417_s11   ;;  %s481_s9 = smov %s413_s10 }
  0xed   : > { %p9_p7 = scmp.ge.s32.totalorder %s12_s11, 4   ;;  %s482_s10 = smov %s484_s12 }
  0xef   :  { %11 = sbr.rel (!%p9_p7) target bundleno = 2 (0x2), region = 69 }

</bundles_post_ra>
